<compile_context>
chip_gen: v5e
topology: v5e:2x2
jax: 0.10.0
libtpu: 0.0.40
codegen_flags: <defaults>
</compile_context>

<pallas_src>
import functools
import math

import jax
import jax.numpy as jnp
from jax.experimental import pallas as pl
from jax.experimental.pallas import tpu as pltpu


LN_EPS = 1e-5
_MXU_DTYPE = jnp.bfloat16
# Per-step budget for resident weights before out_features tiling kicks in
# (leaves room for activation tiles inside v7x's 64 MiB physical VMEM).
_WEIGHT_VMEM_BUDGET = 40 << 20


def _round_up(x, m):
    return ((x + m - 1) // m) * m


# --------------------------------------------------------------------------- #
# Kernels (one (batch_tile, out_tile) block per grid step)
# --------------------------------------------------------------------------- #
def _layernorm_f32(x, gamma, beta):
    """LayerNorm in f32 with single-pass statistics (var = E[x^2] - mu^2)."""
    mu = jnp.mean(x, axis=-1, keepdims=True)
    ex2 = jnp.mean(x * x, axis=-1, keepdims=True)
    var = jnp.maximum(ex2 - mu * mu, 0.0)
    return (x - mu) * jax.lax.rsqrt(var + LN_EPS) * gamma + beta


def _identity_kernel(x_ref, g_ref, b_ref, w_ref, bfc_ref, out_ref, *, tn, out_f):
    """LayerNorm -> Linear -> ReLU -> + x   (in_features == out_features)."""
    x = x_ref[...].astype(jnp.float32)                           # (bt, in_f)
    xn = _layernorm_f32(x, g_ref[...], b_ref[...])
    h = jnp.dot(xn.astype(_MXU_DTYPE), w_ref[...].astype(_MXU_DTYPE),
                preferred_element_type=jnp.float32)
    h = jnp.maximum(h + bfc_ref[...], 0.0)                       # bias + ReLU (f32)
    if tn == out_f:                                              # no N tiling
        ident = x
    else:                                                        # identity => in_f == out_f
        col = pl.program_id(1) * tn
        if tn % 128 == 0:
            col = pl.multiple_of(col, 128)
        ident = x_ref[:, pl.ds(col, tn)].astype(jnp.float32)
    out_ref[...] = (h + ident).astype(out_ref.dtype)


def _skip_kernel(x_ref, g_ref, b_ref, w_ref, bfc_ref, ws_ref, bs_ref, out_ref):
    """Same block with a Linear shortcut (in_features != out_features)."""
    x = x_ref[...].astype(jnp.float32)
    xn = _layernorm_f32(x, g_ref[...], b_ref[...])
    h = jnp.dot(xn.astype(_MXU_DTYPE), w_ref[...].astype(_MXU_DTYPE),
                preferred_element_type=jnp.float32)
    h = jnp.maximum(h + bfc_ref[...], 0.0)
    # TODO(synk): with batch_tile >= 256 the second RHS push is already amortized; a
    #             fused-concat single dot would move ReLU across the sum, so keep 2 dots.
    sk = jnp.dot(x.astype(_MXU_DTYPE), ws_ref[...].astype(_MXU_DTYPE),
                 preferred_element_type=jnp.float32) + bs_ref[...]
    out_ref[...] = (h + sk).astype(out_ref.dtype)


# --------------------------------------------------------------------------- #
# Wrapper
# --------------------------------------------------------------------------- #
def _pick_n_tile(n_tile, in_f, out_f, n_mats, w_itemsize):
    """Out-feature tile: whole out_f unless resident weights exceed the VMEM budget."""
    if n_tile is not None:
        if out_f % n_tile == 0 and (n_tile == out_f or n_tile % 128 == 0):
            return int(n_tile)
        return out_f                                   # invalid request -> no tiling
    if out_f % 128 != 0:
        return out_f                                   # cannot tile lane-dense
    tn = out_f
    while in_f * tn * w_itemsize * n_mats > _WEIGHT_VMEM_BUDGET:
        half = tn // 2
        if half < 128 or half % 128 != 0 or out_f % half != 0:
            break
        tn = half
    return tn


def mlp_res_block(x, params, *, batch_tile=256, n_tile=None, out_dtype=None,
                  vmem_limit_bytes=None):
    """Fused LayerNorm -> Linear -> ReLU -> +shortcut for x of shape (B, in_features)."""
    B, in_f = x.shape
    out_f = params["w_fc"].shape[1]
    has_skip = "w_sc" in params
    if not has_skip:
        assert in_f == out_f, "Identity shortcut requires in_features == out_features"
    out_dtype = jnp.dtype(out_dtype if out_dtype is not None else x.dtype)

    # --- batch tiling: big tiles amortize grid overhead, clamped to the batch ---
    bt = max(8, min(int(batch_tile), _round_up(B, 8)))
    bt = _round_up(bt, 8)
    B_pad = _round_up(B, bt)
    x_in = x if B_pad == B else jnp.pad(x, ((0, B_pad - B), (0, 0)))

    # --- out_features tiling (only if resident weights would not fit VMEM) ---
    n_mats = 2 if has_skip else 1
    w_itemsize = jnp.dtype(params["w_fc"].dtype).itemsize
    tn = _pick_n_tile(n_tile, in_f, out_f, n_mats, w_itemsize)
    num_b, num_n = B_pad // bt, out_f // tn
    grid = (num_b, num_n)

    # --- cost estimate & explicit VMEM limit sized from block footprints ---
    flops = 2 * B_pad * in_f * out_f * n_mats + 8 * B_pad * in_f * num_n
    bytes_accessed = (x_in.size * x_in.dtype.itemsize
                      + in_f * out_f * w_itemsize * n_mats
                      + (in_f + n_mats * out_f) * 4 * 2
                      + B_pad * out_f * out_dtype.itemsize)
    cost = pl.CostEstimate(flops=flops, transcendentals=B_pad * num_n,
                           bytes_accessed=bytes_accessed)
    if vmem_limit_bytes is None:
        est = (2 * bt * in_f * x.dtype.itemsize            # x tile (double-buffered)
               + 2 * bt * tn * out_dtype.itemsize          # out tile
               + 2 * in_f * tn * w_itemsize * n_mats       # weights (assume 2 bufs)
               + 4 * (in_f + n_mats * tn) * 4              # LN params + biases
               + (2 << 20))                                 # slack for temporaries
        vmem_limit_bytes = int(min(max(3 * est // 2, 32 << 20), 100 << 20))

    def build(single_buffer):
        def resident(shape, index_map):
            # Constant-index operands: request a single VMEM buffer (no pipelining).
            if single_buffer:
                return pl.BlockSpec(shape, index_map, pipeline_mode=pl.Buffered(1))
            return pl.BlockSpec(shape, index_map)

        const2 = lambda i, j: (0, 0)
        x_spec = pl.BlockSpec((bt, in_f), lambda i, j: (i, 0))
        g_spec = resident((1, in_f), const2)
        b_spec = resident((1, in_f), const2)
        if num_n == 1:
            w_spec = resident((in_f, out_f), const2)
            bw_spec = resident((1, out_f), const2)
        else:
            w_spec = pl.BlockSpec((in_f, tn), lambda i, j: (0, j))
            bw_spec = pl.BlockSpec((1, tn), lambda i, j: (0, j))

        in_specs = [x_spec, g_spec, b_spec, w_spec, bw_spec]
        args = [x_in, params["ln_g"], params["ln_b"], params["w_fc"], params["b_fc"]]
        if has_skip:
            in_specs += [w_spec, bw_spec]
            args += [params["w_sc"], params["b_sc"]]
            kernel = _skip_kernel
        else:
            kernel = functools.partial(_identity_kernel, tn=tn, out_f=out_f)

        call = pl.pallas_call(
            kernel,
            out_shape=jax.ShapeDtypeStruct((B_pad, out_f), out_dtype),
            grid=grid,
            in_specs=in_specs,
            out_specs=pl.BlockSpec((bt, tn), lambda i, j: (i, j)),
            compiler_params=pltpu.CompilerParams(
                dimension_semantics=("parallel", "parallel"),
                vmem_limit_bytes=vmem_limit_bytes),
            cost_estimate=cost,
        )
        return call, args

    try:
        call, args = build(single_buffer=True)
        out = call(*args)
    except Exception:
        # pipeline_mode=pl.Buffered(1) unsupported on this jax/Mosaic version;
        # fall back to default (double-buffered) resident operands.
        call, args = build(single_buffer=False)
        out = call(*args)
    return out[:B]


# --------------------------------------------------------------------------- #
# Parameter init (matches nn.Linear / nn.LayerNorm defaults; bf16 weights for MXU)
# --------------------------------------------------------------------------- #
def init_params(key, in_features, out_features=None):
    out_features = out_features or in_features
    k1, k2, k3, k4 = jax.random.split(key, 4)
    bound = 1.0 / math.sqrt(in_features)
    params = dict(
        ln_g=jnp.ones((1, in_features), jnp.float32),     # LayerNorm weight
        ln_b=jnp.zeros((1, in_features), jnp.float32),    # LayerNorm bias
        # nn.Linear stores (out, in); keep pre-transposed (in, out) for x @ W.
        w_fc=jax.random.uniform(k1, (in_features, out_features), jnp.float32,
                                -bound, bound).astype(jnp.bfloat16),
        b_fc=jax.random.uniform(k2, (1, out_features), jnp.float32, -bound, bound),
    )
    if in_features != out_features:
        params["w_sc"] = jax.random.uniform(k3, (in_features, out_features),
                                            jnp.float32, -bound, bound
                                            ).astype(jnp.bfloat16)
        params["b_sc"] = jax.random.uniform(k4, (1, out_features), jnp.float32,
                                            -bound, bound)
    return params


# Pure-JAX reference (correctness check only; f32 math, bf16-stored weights upcast).
def ref_forward(params, x):
    x = x.astype(jnp.float32)
    mu = x.mean(-1, keepdims=True)
    var = ((x - mu) ** 2).mean(-1, keepdims=True)
    xn = (x - mu) / jnp.sqrt(var + LN_EPS) * params["ln_g"] + params["ln_b"]
    h = jnp.maximum(xn @ params["w_fc"].astype(jnp.float32) + params["b_fc"], 0.0)
    if "w_sc" in params:
        ident = x @ params["w_sc"].astype(jnp.float32) + params["b_sc"]
    else:
        ident = x
    return h + ident


if __name__ == "__main__":
    key = jax.random.PRNGKey(0)
    k1, k2, k3, k4 = jax.random.split(key, 4)

    # Case 1: Identity shortcut (the only configuration the literal PyTorch module
    # can run), ragged batch to exercise the tail-pad path. Lane-dense features.
    B1, F1 = 50, 128
    p1 = init_params(k1, F1)
    x1 = jax.random.normal(k2, (B1, F1), jnp.float32)
    o1 = jax.block_until_ready(mlp_res_block(x1, p1))
    r1 = ref_forward(p1, x1)
    assert o1.shape == r1.shape, (o1.shape, r1.shape)
    assert jnp.allclose(o1, r1, atol=2e-2, rtol=2e-2), \
        float(jnp.max(jnp.abs(o1 - r1)))

    # Case 2: Linear shortcut, forced out_features tiling (tn=128) to exercise the
    # N-tiled weight path used when weights do not fit VMEM (e.g. v7x).
    B2, Fin, Fout = 64, 128, 256
    p2 = init_params(k3, Fin, Fout)
    x2 = jax.random.normal(k4, (B2, Fin), jnp.float32)
    o2 = jax.block_until_ready(mlp_res_block(x2, p2, n_tile=128))
    r2 = ref_forward(p2, x2)
    assert o2.shape == r2.shape, (o2.shape, r2.shape)
    assert jnp.allclose(o2, r2, atol=2e-2, rtol=2e-2), \
        float(jnp.max(jnp.abs(o2 - r2)))

    print("KERNEL_OK")
</pallas_src>

<mosaic_0001>
module attributes {stable_mosaic.version = 11 : i64} {
  func.func @_identity_kernel(%arg0: i32, %arg1: i32, %arg2: memref<56x128xf32, #tpu.memory_space<vmem>>, %arg3: memref<1x128xf32, #tpu.memory_space<vmem>>, %arg4: memref<1x128xf32, #tpu.memory_space<vmem>>, %arg5: memref<128x128xbf16, #tpu.memory_space<vmem>>, %arg6: memref<1x128xf32, #tpu.memory_space<vmem>>, %arg7: memref<56x128xf32, #tpu.memory_space<vmem>>) attributes {dimension_semantics = [#tpu.dimension_semantics<parallel>, #tpu.dimension_semantics<parallel>], iteration_bounds = array<i64: 1, 1>, scalar_prefetch = 0 : i64, scratch_operands = 0 : i64, tpu.core_type = #tpu.core_type<tc>, window_params = [{transform_indices = @transform_0, window_bounds = array<i64: 56, 128>}, {pipeline_mode = #tpu.pipeline_mode<synchronous>, transform_indices = @transform_1, window_bounds = array<i64: 1, 128>}, {pipeline_mode = #tpu.pipeline_mode<synchronous>, transform_indices = @transform_2, window_bounds = array<i64: 1, 128>}, {pipeline_mode = #tpu.pipeline_mode<synchronous>, transform_indices = @transform_3, window_bounds = array<i64: 128, 128>}, {pipeline_mode = #tpu.pipeline_mode<synchronous>, transform_indices = @transform_4, window_bounds = array<i64: 1, 128>}, {transform_indices = @transform_5, window_bounds = array<i64: 56, 128>}]} {
    %c0 = arith.constant 0 : index
    %c0_0 = arith.constant 0 : index
    %0 = vector.load %arg2[%c0, %c0_0] : memref<56x128xf32, #tpu.memory_space<vmem>>, vector<56x128xf32>
    %c0_1 = arith.constant 0 : index
    %c0_2 = arith.constant 0 : index
    %1 = vector.load %arg3[%c0_1, %c0_2] : memref<1x128xf32, #tpu.memory_space<vmem>>, vector<1x128xf32>
    %c0_3 = arith.constant 0 : index
    %c0_4 = arith.constant 0 : index
    %2 = vector.load %arg4[%c0_3, %c0_4] : memref<1x128xf32, #tpu.memory_space<vmem>>, vector<1x128xf32>
    %cst = arith.constant dense<0.000000e+00> : vector<56xf32>
    %3 = vector.multi_reduction <add>, %0, %cst [1] : vector<56x128xf32> to vector<56xf32>
    %4 = vector.shape_cast %3 : vector<56xf32> to vector<56x1xf32>
    %cst_5 = arith.constant 1.280000e+02 : f32
    %5 = vector.broadcast %cst_5 : f32 to vector<56x1xf32>
    %6 = arith.divf %4, %5 : vector<56x1xf32>
    %7 = arith.mulf %0, %0 : vector<56x128xf32>
    %cst_6 = arith.constant dense<0.000000e+00> : vector<56xf32>
    %8 = vector.multi_reduction <add>, %7, %cst_6 [1] : vector<56x128xf32> to vector<56xf32>
    %9 = vector.shape_cast %8 : vector<56xf32> to vector<56x1xf32>
    %cst_7 = arith.constant 1.280000e+02 : f32
    %10 = vector.broadcast %cst_7 : f32 to vector<56x1xf32>
    %11 = arith.divf %9, %10 : vector<56x1xf32>
    %12 = arith.mulf %6, %6 : vector<56x1xf32>
    %13 = arith.subf %11, %12 : vector<56x1xf32>
    %cst_8 = arith.constant 0.000000e+00 : f32
    %14 = vector.broadcast %cst_8 : f32 to vector<56x1xf32>
    %15 = arith.maximumf %13, %14 : vector<56x1xf32>
    %16 = vector.broadcast %6 : vector<56x1xf32> to vector<56x128xf32>
    %17 = arith.subf %0, %16 : vector<56x128xf32>
    %cst_9 = arith.constant 9.99999974E-6 : f32
    %18 = vector.broadcast %cst_9 : f32 to vector<56x1xf32>
    %19 = arith.addf %15, %18 : vector<56x1xf32>
    %20 = math.rsqrt %19 : vector<56x1xf32>
    %21 = vector.broadcast %20 : vector<56x1xf32> to vector<56x128xf32>
    %22 = arith.mulf %17, %21 : vector<56x128xf32>
    %23 = vector.broadcast %1 : vector<1x128xf32> to vector<56x128xf32>
    %24 = arith.mulf %22, %23 : vector<56x128xf32>
    %25 = vector.broadcast %2 : vector<1x128xf32> to vector<56x128xf32>
    %26 = arith.addf %24, %25 : vector<56x128xf32>
    %27 = arith.truncf %26 : vector<56x128xf32> to vector<56x128xbf16>
    %c0_10 = arith.constant 0 : index
    %c0_11 = arith.constant 0 : index
    %28 = vector.load %arg5[%c0_10, %c0_11] : memref<128x128xbf16, #tpu.memory_space<vmem>>, vector<128x128xbf16>
    %cst_12 = arith.constant dense<0.000000e+00> : vector<56x128xf32>
    %29 = tpu.matmul %27, %28, %cst_12 {dimension_numbers = #tpu.dot_dimension_numbers<[1], [0], [0], [1], [0, 0, 1, 1], [], []>} : vector<56x128xbf16>, vector<128x128xbf16>, vector<56x128xf32> -> vector<56x128xf32>
    %c0_13 = arith.constant 0 : index
    %c0_14 = arith.constant 0 : index
    %30 = vector.load %arg6[%c0_13, %c0_14] : memref<1x128xf32, #tpu.memory_space<vmem>>, vector<1x128xf32>
    %31 = vector.broadcast %30 : vector<1x128xf32> to vector<56x128xf32>
    %32 = arith.addf %29, %31 : vector<56x128xf32>
    %cst_15 = arith.constant 0.000000e+00 : f32
    %33 = vector.broadcast %cst_15 : f32 to vector<56x128xf32>
    %34 = arith.maximumf %32, %33 : vector<56x128xf32>
    %35 = arith.addf %34, %0 : vector<56x128xf32>
    %c0_16 = arith.constant 0 : index
    %c0_17 = arith.constant 0 : index
    %36 = vector.load %arg7[%c0_16, %c0_17] : memref<56x128xf32, #tpu.memory_space<vmem>>, vector<56x128xf32>
    tpu.vector_store %arg7[%c0_16, %c0_17], %35 {strides = array<i32>} : memref<56x128xf32, #tpu.memory_space<vmem>>, vector<56x128xf32>,
    return
  }
  func.func @transform_0(%arg0: i32, %arg1: i32) -> (i32, i32) {
    %c0_i32 = arith.constant 0 : i32
    %c0_i32_0 = arith.constant 0 : i32
    return %arg0, %c0_i32 : i32, i32
  }
  func.func @transform_1(%arg0: i32, %arg1: i32) -> (i32, i32) {
    %c0_i32 = arith.constant 0 : i32
    %c0_i32_0 = arith.constant 0 : i32
    %c0_i32_1 = arith.constant 0 : i32
    return %c0_i32, %c0_i32_0 : i32, i32
  }
  func.func @transform_2(%arg0: i32, %arg1: i32) -> (i32, i32) {
    %c0_i32 = arith.constant 0 : i32
    %c0_i32_0 = arith.constant 0 : i32
    %c0_i32_1 = arith.constant 0 : i32
    return %c0_i32, %c0_i32_0 : i32, i32
  }
  func.func @transform_3(%arg0: i32, %arg1: i32) -> (i32, i32) {
    %c0_i32 = arith.constant 0 : i32
    %c0_i32_0 = arith.constant 0 : i32
    %c0_i32_1 = arith.constant 0 : i32
    return %c0_i32, %c0_i32_0 : i32, i32
  }
  func.func @transform_4(%arg0: i32, %arg1: i32) -> (i32, i32) {
    %c0_i32 = arith.constant 0 : i32
    %c0_i32_0 = arith.constant 0 : i32
    %c0_i32_1 = arith.constant 0 : i32
    return %c0_i32, %c0_i32_0 : i32, i32
  }
  func.func @transform_5(%arg0: i32, %arg1: i32) -> (i32, i32) {
    %c0_i32 = arith.constant 0 : i32
    return %arg0, %arg1 : i32, i32
  }
}

module attributes {stable_mosaic.version = 11 : i64} {
  func.func @_identity_kernel(%arg0: i32, %arg1: i32, %arg2: memref<56x128xf32, #tpu.memory_space<vmem>>, %arg3: memref<1x128xf32, #tpu.memory_space<vmem>>, %arg4: memref<1x128xf32, #tpu.memory_space<vmem>>, %arg5: memref<128x128xbf16, #tpu.memory_space<vmem>>, %arg6: memref<1x128xf32, #tpu.memory_space<vmem>>, %arg7: memref<56x128xf32, #tpu.memory_space<vmem>>) attributes {dimension_semantics = [#tpu.dimension_semantics<parallel>, #tpu.dimension_semantics<parallel>], iteration_bounds = array<i64: 1, 1>, scalar_prefetch = 0 : i64, scratch_operands = 0 : i64, tpu.core_type = #tpu.core_type<tc>, window_params = [{transform_indices = @transform_0, window_bounds = array<i64: 56, 128>}, {pipeline_mode = #tpu.pipeline_mode<synchronous>, transform_indices = @transform_1, window_bounds = array<i64: 1, 128>}, {pipeline_mode = #tpu.pipeline_mode<synchronous>, transform_indices = @transform_2, window_bounds = array<i64: 1, 128>}, {pipeline_mode = #tpu.pipeline_mode<synchronous>, transform_indices = @transform_3, window_bounds = array<i64: 128, 128>}, {pipeline_mode = #tpu.pipeline_mode<synchronous>, transform_indices = @transform_4, window_bounds = array<i64: 1, 128>}, {transform_indices = @transform_5, window_bounds = array<i64: 56, 128>}]} {
    %c0 = arith.constant 0 : index
    %c0_0 = arith.constant 0 : index
    %0 = vector.load %arg2[%c0, %c0_0] : memref<56x128xf32, #tpu.memory_space<vmem>>, vector<56x128xf32>
    %c0_1 = arith.constant 0 : index
    %c0_2 = arith.constant 0 : index
    %1 = vector.load %arg3[%c0_1, %c0_2] : memref<1x128xf32, #tpu.memory_space<vmem>>, vector<1x128xf32>
    %c0_3 = arith.constant 0 : index
    %c0_4 = arith.constant 0 : index
    %2 = vector.load %arg4[%c0_3, %c0_4] : memref<1x128xf32, #tpu.memory_space<vmem>>, vector<1x128xf32>
    %cst = arith.constant dense<0.000000e+00> : vector<56xf32>
    %3 = vector.multi_reduction <add>, %0, %cst [1] : vector<56x128xf32> to vector<56xf32>
    %4 = vector.shape_cast %3 : vector<56xf32> to vector<56x1xf32>
    %cst_5 = arith.constant 1.280000e+02 : f32
    %5 = vector.broadcast %cst_5 : f32 to vector<56x1xf32>
    %6 = arith.divf %4, %5 : vector<56x1xf32>
    %7 = arith.mulf %0, %0 : vector<56x128xf32>
    %cst_6 = arith.constant dense<0.000000e+00> : vector<56xf32>
    %8 = vector.multi_reduction <add>, %7, %cst_6 [1] : vector<56x128xf32> to vector<56xf32>
    %9 = vector.shape_cast %8 : vector<56xf32> to vector<56x1xf32>
    %cst_7 = arith.constant 1.280000e+02 : f32
    %10 = vector.broadcast %cst_7 : f32 to vector<56x1xf32>
    %11 = arith.divf %9, %10 : vector<56x1xf32>
    %12 = arith.mulf %6, %6 : vector<56x1xf32>
    %13 = arith.subf %11, %12 : vector<56x1xf32>
    %cst_8 = arith.constant 0.000000e+00 : f32
    %14 = vector.broadcast %cst_8 : f32 to vector<56x1xf32>
    %15 = arith.maximumf %13, %14 : vector<56x1xf32>
    %16 = vector.broadcast %6 : vector<56x1xf32> to vector<56x128xf32>
    %17 = arith.subf %0, %16 : vector<56x128xf32>
    %cst_9 = arith.constant 9.99999974E-6 : f32
    %18 = vector.broadcast %cst_9 : f32 to vector<56x1xf32>
    %19 = arith.addf %15, %18 : vector<56x1xf32>
    %20 = math.rsqrt %19 : vector<56x1xf32>
    %21 = vector.broadcast %20 : vector<56x1xf32> to vector<56x128xf32>
    %22 = arith.mulf %17, %21 : vector<56x128xf32>
    %23 = vector.broadcast %1 : vector<1x128xf32> to vector<56x128xf32>
    %24 = arith.mulf %22, %23 : vector<56x128xf32>
    %25 = vector.broadcast %2 : vector<1x128xf32> to vector<56x128xf32>
    %26 = arith.addf %24, %25 : vector<56x128xf32>
    %27 = arith.truncf %26 : vector<56x128xf32> to vector<56x128xbf16>
    %c0_10 = arith.constant 0 : index
    %c0_11 = arith.constant 0 : index
    %28 = vector.load %arg5[%c0_10, %c0_11] : memref<128x128xbf16, #tpu.memory_space<vmem>>, vector<128x128xbf16>
    %cst_12 = arith.constant dense<0.000000e+00> : vector<56x128xf32>
    %29 = tpu.matmul %27, %28, %cst_12 {dimension_numbers = #tpu.dot_dimension_numbers<[1], [0], [0], [1], [0, 0, 1, 1], [], []>} : vector<56x128xbf16>, vector<128x128xbf16>, vector<56x128xf32> -> vector<56x128xf32>
    %c0_13 = arith.constant 0 : index
    %c0_14 = arith.constant 0 : index
    %30 = vector.load %arg6[%c0_13, %c0_14] : memref<1x128xf32, #tpu.memory_space<vmem>>, vector<1x128xf32>
    %31 = vector.broadcast %30 : vector<1x128xf32> to vector<56x128xf32>
    %32 = arith.addf %29, %31 : vector<56x128xf32>
    %cst_15 = arith.constant 0.000000e+00 : f32
    %33 = vector.broadcast %cst_15 : f32 to vector<56x128xf32>
    %34 = arith.maximumf %32, %33 : vector<56x128xf32>
    %35 = arith.addf %34, %0 : vector<56x128xf32>
    %c0_16 = arith.constant 0 : index
    %c0_17 = arith.constant 0 : index
    %36 = vector.load %arg7[%c0_16, %c0_17] : memref<56x128xf32, #tpu.memory_space<vmem>>, vector<56x128xf32>
    tpu.vector_store %arg7[%c0_16, %c0_17], %35 {strides = array<i32>} : memref<56x128xf32, #tpu.memory_space<vmem>>, vector<56x128xf32>,
    return
  }
  func.func @transform_0(%arg0: i32, %arg1: i32) -> (i32, i32) {
    %c0_i32 = arith.constant 0 : i32
    %c0_i32_0 = arith.constant 0 : i32
    return %arg0, %c0_i32 : i32, i32
  }
  func.func @transform_1(%arg0: i32, %arg1: i32) -> (i32, i32) {
    %c0_i32 = arith.constant 0 : i32
    %c0_i32_0 = arith.constant 0 : i32
    %c0_i32_1 = arith.constant 0 : i32
    return %c0_i32, %c0_i32_0 : i32, i32
  }
  func.func @transform_2(%arg0: i32, %arg1: i32) -> (i32, i32) {
    %c0_i32 = arith.constant 0 : i32
    %c0_i32_0 = arith.constant 0 : i32
    %c0_i32_1 = arith.constant 0 : i32
    return %c0_i32, %c0_i32_0 : i32, i32
  }
  func.func @transform_3(%arg0: i32, %arg1: i32) -> (i32, i32) {
    %c0_i32 = arith.constant 0 : i32
    %c0_i32_0 = arith.constant 0 : i32
    %c0_i32_1 = arith.constant 0 : i32
    return %c0_i32, %c0_i32_0 : i32, i32
  }
  func.func @transform_4(%arg0: i32, %arg1: i32) -> (i32, i32) {
    %c0_i32 = arith.constant 0 : i32
    %c0_i32_0 = arith.constant 0 : i32
    %c0_i32_1 = arith.constant 0 : i32
    return %c0_i32, %c0_i32_0 : i32, i32
  }
  func.func @transform_5(%arg0: i32, %arg1: i32) -> (i32, i32) {
    %c0_i32 = arith.constant 0 : i32
    return %arg0, %arg1 : i32, i32
  }
}

</mosaic_0001>

<bundles_post_ra>
// kernel: tpu_custom_call.1
= control target key start
LH: loop header
LB: loop body
LE: loop exit
PB: predicated region body
PF: predicated region fallthrough
CT: control target
= control target key end

     0   :  { %10 = vsyncpa [#allocation3], 0  ;;  %s807_s0 = inlined_call_operand.hbm [shape: f32[56,128], index: 0, kind: input, shape index: {}]   ;;  %s808_s1 = inlined_call_operand.hbm [shape: f32[1,128], index: 1, kind: input, shape index: {}]   ;;  %s809_s2 = inlined_call_operand.vmem [shape: f32[1,128], index: 2, kind: input, shape index: {}]   ;;  %s810_s3 = inlined_call_operand.hbm [shape: bf16[128,128], index: 3, kind: input, shape index: {}]   ;;  %s811_s4 = inlined_call_operand.vmem [shape: f32[1,128], index: 4, kind: input, shape index: {}]   ;;  %s812_s5 = inlined_call_operand.hbm [shape: f32[56,128], index: 5, kind: output, shape index: {}]  }
   0x1   :  { %11 = vsyncpa [#allocation6], 0  ;;  %s31_s20 = sshll.u32 %s808_s1, 4  ;;  %s32_s20 = int_to_ptr.hbm [resolvable:$true] %s31_s20 }
   0x2   :  { %12 = vsyncpa [#allocation4], 0  ;;  %s598_s21 = smov [#allocation5]   ;;  %s17_s25 = sshll.u32 %s807_s0, 4  ;;  %s18_s25 = int_to_ptr.hbm [resolvable:$true] %s17_s25 }
   0x3   :  { %s33_s22 = sshll.u32 %s598_s21, 4  ;;  %s599_s26 = smov [#allocation2]   ;;  %s34_s22 = int_to_ptr.vmem [resolvable:$true] %s33_s22 }
   0x4   :  { %36 = dma.hbm_to_vmem [thread:$0]  %s32_s20, 16, %s34_s22, [#allocation6]  }
   0x5   :  { %s19_s27 = sshll.u32 %s599_s26, 4  ;;  %s600_s28 = smov 128   ;;  %s20_s27 = int_to_ptr.vmem [resolvable:$true] %s19_s27 }
   0x6   :  { %s601_s29 = smov 8   ;;  %s43_s6 = sshll.u32 %s810_s3, 4  ;;  %s44_s6 = int_to_ptr.hbm [resolvable:$true] %s43_s6 }
   0x7   :  { %25 = dma.hbm_to_vmem [thread:$0]  %s18_s25, 896, %s20_s27, [#allocation3], %s600_s28, %s600_s28, %s601_s29  }
   0x8   :  { %s602_s7 = smov [#allocation7]   ;;  %s603_s0 = smov 64  }
   0x9   :  { %s45_s8 = sshll.u32 %s602_s7, 4  ;;  %s604_s9 = smov 4   ;;  %s46_s8 = int_to_ptr.vmem [resolvable:$true] %s45_s8 }
   0xa   :  { %51 = dma.hbm_to_vmem [thread:$0]  %s44_s6, 1024, %s46_s8, [#allocation6], %s603_s0, %s603_s0, %s604_s9  }
   0xb   :  { %592 = dma.done.wait [#allocation3], 896  }
   0xc   :  { %593 = vsyncadd [#allocation3], 4294966400 }
   0xd   :  { %594 = dma.done.wait [#allocation6], 1040  }
   0xe   :  { %595 = vsyncadd [#allocation6], 4294966256  ;;  %v649_v0 = vld [vmem:[#allocation2 + $0x20] sm:$0xff]  ;;  %v657_v3 = vld [vmem:[#allocation2 + $0x28] sm:$0xff]  ;;  %v605_v14 = vmov 128.0   ;;  %s390_s15 = sshll.u32 %s812_s5, 4  ;;  %s391_s15 = int_to_ptr.hbm [resolvable:$true] %s390_s15 }
   0xf   :  { %v651_v1 = vld [vmem:[#allocation2] sm:$0xff]  ;;  %83 = vadd.xlane.f32.xlu0 %v649_v0  ;;  %v107_v2 = vmul.f32 %v649_v0, %v649_v0  ;;  %v659_v4 = vld [vmem:[#allocation2 + $0x8] sm:$0xff]  ;;  %v108_v5 = vmul.f32 %v657_v3, %v657_v3  ;;  %v665_v6 = vld [vmem:[#allocation2 + $0x10] sm:$0xff]  ;;  %480 = vrcp.f32 %v605_v14 }
  0x10   :  { %75 = vadd.xlane.f32.xlu2 %v651_v1  ;;  %v667_v7 = vld [vmem:[#allocation2 + $0x30] sm:$0xff]  ;;  %v669_v8 = vld [vmem:[#allocation2 + $0x18] sm:$0xff]  ;;  %v105_v9 = vmul.f32 %v665_v6, %v665_v6  ;;  %v103_v10 = vmul.f32 %v651_v1, %v651_v1  ;;  %v104_v11 = vmul.f32 %v659_v4, %v659_v4  ;;  %v441_v21 = vld [vmem:[#allocation7 + $0x28] sm:$0xff] }
  0x11   :  { %118 = vadd.xlane.f32.xlu1 %v107_v2  ;;  %v106_v12 = vmul.f32 %v669_v8, %v669_v8  ;;  %v109_v13 = vmul.f32 %v667_v7, %v667_v7  ;;  %v443_v16 = vld [vmem:[#allocation7 + $0x38] sm:$0xff]  ;;  %v442_v18 = vld [vmem:[#allocation7 + $0x30] sm:$0xff]  ;;  %v440_v23 = vld [vmem:[#allocation7 + $0x20] sm:$0xff] }
  0x12   :  { %445 = vmatpush.bf16.msra.mxu2 %v443_v16  ;;  %335 = vmatpush.bf16.msra.mxu0 %v443_v16  ;;  %v439_v25 = vld [vmem:[#allocation7 + $0x18] sm:$0xff]  ;;  %v438_v30 = vld [vmem:[#allocation7 + $0x10] sm:$0xff]  ;;  %v437_v34 = vld [vmem:[#allocation7 + $0x8] sm:$0xff] }
  0x13   :  { %444 = vmatpush.bf16.msra.mxu1 %v443_v16  ;;  %446 = vmatpush.bf16.msra.mxu3 %v443_v16  ;;  %v436_v41 = vld [vmem:[#allocation7] sm:$0xff] }
  0x15   :  { %v481_v15 = vpop.eup %480 }
  0x16   :  { %v90_v17 = vmul.f32 128.0, %v481_v15  ;;  %448 = vmatpush.bf16.msra.mxu2 %v442_v18  ;;  %336 = vmatpush.bf16.msra.mxu0 %v442_v18  ;;  %vm94_vm0 = vweird.f32 %v481_v15 }
  0x17   :  { %85 = vadd.xlane.f32.xlu0 %v657_v3  ;;  %447 = vmatpush.bf16.msra.mxu1 %v442_v18 }
  0x18   :  { %77 = vadd.xlane.f32.xlu2 %v659_v4  ;;  %v91_v19 = vsub.f32 1.0, %v90_v17  ;;  %449 = vmatpush.bf16.msra.mxu3 %v442_v18 }
  0x19   :  { %120 = vadd.xlane.f32.xlu1 %v108_v5 }
  0x1a   :  { %v92_v20 = vmul.f32 %v481_v15, %v91_v19  ;;  %451 = vmatpush.bf16.msra.mxu2 %v441_v21  ;;  %337 = vmatpush.bf16.msra.mxu0 %v441_v21 }
  0x1b   :  { %450 = vmatpush.bf16.msra.mxu1 %v441_v21 }
  0x1c   :  { %452 = vmatpush.bf16.msra.mxu3 %v441_v21  ;;  %v93_v22 = vadd.f32 %v481_v15, %v92_v20 }
  0x1e   :  { %454 = vmatpush.bf16.msra.mxu2 %v440_v23  ;;  %338 = vmatpush.bf16.msra.mxu0 %v440_v23  ;;  %v684_v24 = vsel %vm94_vm0, %v481_v15, %v93_v22 }
  0x1f   :  { %79 = vadd.xlane.f32.xlu0 %v665_v6  ;;  %453 = vmatpush.bf16.msra.mxu1 %v440_v23 }
  0x20   :  { %87 = vadd.xlane.f32.xlu2 %v667_v7  ;;  %455 = vmatpush.bf16.msra.mxu3 %v440_v23 }
  0x21   :  { %81 = vadd.xlane.f32.xlu1 %v669_v8 }
  0x22   :  { %457 = vmatpush.bf16.msra.mxu2 %v439_v25  ;;  %339 = vmatpush.bf16.msra.mxu0 %v439_v25 }
  0x23   :  { %456 = vmatpush.bf16.msra.mxu1 %v439_v25 }
  0x24   :  { %458 = vmatpush.bf16.msra.mxu3 %v439_v25 }
  0x26   :  { %460 = vmatpush.bf16.msra.mxu2 %v438_v30  ;;  %340 = vmatpush.bf16.msra.mxu0 %v438_v30 }
  0x27   :  { %110 = vadd.xlane.f32.xlu0 %v103_v10  ;;  %459 = vmatpush.bf16.msra.mxu1 %v438_v30 }
  0x28   :  { %114 = vadd.xlane.f32.xlu2 %v105_v9  ;;  %461 = vmatpush.bf16.msra.mxu3 %v438_v30 }
  0x29   :  { %112 = vadd.xlane.f32.xlu1 %v104_v11 }
  0x2a   :  { %463 = vmatpush.bf16.msra.mxu2 %v437_v34  ;;  %341 = vmatpush.bf16.msra.mxu0 %v437_v34 }
  0x2b   :  { %462 = vmatpush.bf16.msra.mxu1 %v437_v34 }
  0x2c   :  { %464 = vmatpush.bf16.msra.mxu3 %v437_v34 }
  0x2e   :  { %466 = vmatpush.bf16.msra.mxu2 %v436_v41  ;;  %342 = vmatpush.bf16.msra.mxu0 %v436_v41 }
  0x2f   :  { %116 = vadd.xlane.f32.xlu0 %v106_v12  ;;  %465 = vmatpush.bf16.msra.mxu1 %v436_v41 }
  0x30   :  { %467 = vmatpush.bf16.msra.mxu3 %v436_v41 }
  0x31   :  { %122 = vadd.xlane.f32.xlu1 %v109_v13 }
  0x82   :  { %v84_v26 = vpop.xlane.xlu0 %83 }
  0x83   :  { %v76_v27 = vpop.xlane.xlu2 %75  ;;  %v687_v28 = vmul.f32 %v684_v24, %v84_v26 }
  0x84   :  { %v119_v29 = vpop.xlane.xlu1 %118  ;;  %v699_v52 = vmul.f32 %v684_v24, %v76_v27 }
  0x85   :  { %v135_v31 = vmul.f32 %v687_v28, %v687_v28  ;;  %v128_v32 = vmul.f32 %v119_v29, %v684_v24  ;;  %v156_v27 = vsub.f32 %v649_v0, %v687_v28 }
  0x86   :  { %v131_v56 = vmul.f32 %v699_v52, %v699_v52 }
  0x87   :  { %v142_v33 = vsub.f32 %v128_v32, %v135_v31 }
  0x89   :  { %v149_v35 = vmax.f32 %v142_v33, 0.0 }
  0x8a   :  { %v86_v36 = vpop.xlane.xlu0 %85 }
  0x8b   :  { %v78_v37 = vpop.xlane.xlu2 %77  ;;  %v693_v38 = vmul.f32 %v684_v24, %v86_v36  ;;  %v163_v39 = vadd.f32 1e-05, %v149_v35 }
  0x8c   :  { %v121_v40 = vpop.xlane.xlu1 %120  ;;  %v707_v57 = vmul.f32 %v684_v24, %v78_v37  ;;  %v741_v37 = vld [vmem:[#allocation5] ss:$0 sm:$0xff] }
  0x8d   :  { %v136_v42 = vmul.f32 %v693_v38, %v693_v38  ;;  %482 = vrsqrt.f32 %v163_v39  ;;  %v129_v43 = vmul.f32 %v121_v40, %v684_v24  ;;  %vm212_vm2 = vweird.f32 %v163_v39 }
  0x8e   :  { %v132_v12 = vmul.f32 %v707_v57, %v707_v57  ;;  %v157_v41 = vsub.f32 %v657_v3, %v693_v38 }
  0x8f   :  { %v143_v44 = vsub.f32 %v129_v43, %v136_v42 }
  0x91   :  { %v150_v45 = vmax.f32 %v143_v44, 0.0 }
  0x92   :  { %v80_v46 = vpop.xlane.xlu0 %79 }
  0x93   :  { %v88_v47 = vpop.xlane.xlu2 %87  ;;  %v483_v48 = vpop.eup %482  ;;  %v164_v49 = vadd.f32 1e-05, %v150_v45  ;;  %v702_v54 = vmul.f32 %v684_v24, %v80_v46 }
  0x94   :  { %v82_v50 = vpop.xlane.xlu1 %81  ;;  %v207_v51 = vmul.f32 %v483_v48, %v163_v39  ;;  %vm213_vm1 = vweird.f32 %v483_v48  ;;  %v724_v20 = vmul.f32 %v684_v24, %v88_v47 }
  0x95   :  { %484 = vrsqrt.f32 %v164_v49  ;;  %v133_v61 = vmul.f32 %v702_v54, %v702_v54  ;;  %v717_v16 = vmul.f32 %v684_v24, %v82_v50  ;;  %vm719_vm3 = vmor %vm212_vm2, %vm213_vm1  ;;  %vm222_vm5 = vweird.f32 %v164_v49 }
  0x96   :  { %v208_v53 = vmul.f32 %v483_v48, %v207_v51  ;;  %v137_v28 = vmul.f32 %v724_v20, %v724_v20 }
  0x97   :  { %v134_v32 = vmul.f32 %v717_v16, %v717_v16 }
  0x98   :  { %v209_v55 = vmul.f32 0.5, %v208_v53 }
  0x9a   :  { %v111_v59 = vpop.xlane.xlu0 %110  ;;  %v210_v60 = vsub.f32 1.5, %v209_v55 }
  0x9b   :  { %v115_v58 = vpop.xlane.xlu2 %114  ;;  %v124_v63 = vmul.f32 %v111_v59, %v684_v24  ;;  %v485_v2 = vpop.eup %484 }
  0x9c   :  { %v126_v62 = vmul.f32 %v115_v58, %v684_v24  ;;  %v113_v5 = vpop.xlane.xlu1 %112  ;;  %v217_v9 = vmul.f32 %v485_v2, %v164_v49  ;;  %v211_v14 = vmul.f32 %v483_v48, %v210_v60  ;;  %vm223_vm4 = vweird.f32 %v485_v2 }
  0x9d   :  { %v138_v11 = vsub.f32 %v124_v63, %v131_v56  ;;  %v125_v13 = vmul.f32 %v113_v5, %v684_v24  ;;  %vm224_vm6 = vmor %vm222_vm5, %vm223_vm4 }
  0x9e   :  { %v140_v10 = vsub.f32 %v126_v62, %v133_v61  ;;  %v218_v15 = vmul.f32 %v485_v2, %v217_v9  ;;  %v215_v26 = vsel %vm719_vm3, %v483_v48, %v211_v14  ;;  %v753_v48 = vld [vmem:[%s809_s2] ss:$0 sm:$0xff] }
  0x9f   :  { %v145_v18 = vmax.f32 %v138_v11, 0.0  ;;  %v139_v21 = vsub.f32 %v125_v13, %v132_v12  ;;  %v240_v36 = vmul.f32 %v215_v26, %v156_v27 }
  0xa0   :  { %v147_v17 = vmax.f32 %v140_v10, 0.0  ;;  %v219_v22 = vmul.f32 0.5, %v218_v15 }
  0xa1   :  { %v728_v25 = vadd.f32 1e-05, %v145_v18  ;;  %v146_v29 = vmax.f32 %v139_v21, 0.0  ;;  %v250_v47 = vmul.f32 %v741_v37, %v240_v36  ;;  %v154_v36 = vsub.f32 %v665_v6, %v702_v54 }
  0xa2   :  { %v726_v23 = vadd.f32 1e-05, %v147_v17  ;;  %v117_v30 = vpop.xlane.xlu0 %116  ;;  %v220_v31 = vsub.f32 1.5, %v219_v22  ;;  %v152_v22 = vsub.f32 %v651_v1, %v699_v52 }
  0xa3   :  { %v738_v33 = vadd.f32 1e-05, %v146_v29  ;;  %v127_v34 = vmul.f32 %v117_v30, %v684_v24  ;;  %v260_v60 = vadd.f32 %v753_v48, %v250_v47  ;;  %vm172_vm9 = vweird.f32 %v728_v25 }
  0xa4   :  { %486 = vrsqrt.f32 %v726_v23  ;;  %v123_v35 = vpop.xlane.xlu1 %122  ;;  %v221_v40 = vmul.f32 %v485_v2, %v220_v31  ;;  %vm192_vm11 = vweird.f32 %v726_v23  ;;  %v153_v31 = vsub.f32 %v659_v4, %v707_v57 }
  0xa5   :  { %488 = vrsqrt.f32 %v728_v25  ;;  %v130_v39 = vmul.f32 %v123_v35, %v684_v24  ;;  %v141_v42 = vsub.f32 %v127_v34, %v134_v32  ;;  %vm182_vm14 = vweird.f32 %v738_v33 }
  0xa6   :  { %490 = vrsqrt.f32 %v738_v33  ;;  %v225_v44 = vsel %vm224_vm6, %v485_v2, %v221_v40  ;;  %v158_v47 = vsub.f32 %v667_v7, %v724_v20 }
  0xa7   :  { %v144_v43 = vsub.f32 %v130_v39, %v137_v28  ;;  %v148_v45 = vmax.f32 %v141_v42, 0.0  ;;  %v241_v46 = vmul.f32 %v225_v44, %v157_v41 }
  0xa9   :  { %v151_v49 = vmax.f32 %v144_v43, 0.0  ;;  %v162_v51 = vadd.f32 1e-05, %v148_v45  ;;  %v251_v53 = vmul.f32 %v741_v37, %v241_v46  ;;  %v155_v43 = vsub.f32 %v669_v8, %v717_v16 }
  0xaa   :  { %v487_v24 = vpop.eup %486 }
  0xab   :  { %v489_v50 = vpop.eup %488  ;;  %v187_v38 = vmul.f32 %v487_v24, %v726_v23  ;;  %v165_v56 = vadd.f32 1e-05, %v151_v49  ;;  %492 = vrsqrt.f32 %v162_v51  ;;  %v261_v61 = vadd.f32 %v753_v48, %v251_v53 }
  0xac   :  { %v167_v55 = vmul.f32 %v489_v50, %v728_v25  ;;  %v491_v58 = vpop.eup %490  ;;  %vm173_vm7 = vweird.f32 %v489_v50  ;;  %vm193_vm8 = vweird.f32 %v487_v24  ;;  %vm202_vm2 = vweird.f32 %v162_v51 }
  0xad   :  { %v188_v59 = vmul.f32 %v487_v24, %v187_v38  ;;  %v177_v63 = vmul.f32 %v491_v58, %v738_v33  ;;  %494 = vrsqrt.f32 %v165_v56  ;;  %v265_v5 = vpack.c.bf16 %v261_v61, %v260_v60  ;;  %vm174_vm12 = vmor %vm172_vm9, %vm173_vm7  ;;  %v479_v61 = vld [vmem:[%s811_s4] ss:$0 sm:$0xff]  ;;  %s606_s4 = smov [#allocation8]  }
  0xae   :  { %v168_v62 = vmul.f32 %v489_v50, %v167_v55  ;;  %vm183_vm10 = vweird.f32 %v491_v58  ;;  %vm765_vm13 = vmor %vm192_vm11, %vm193_vm8  ;;  %vm232_vm4 = vweird.f32 %v165_v56  ;;  %s388_s12 = sshll.u32 %s606_s4, 4  ;;  %s389_s12 = int_to_ptr.vmem [resolvable:$true] %s388_s12 }
  0xaf   :  { %v189_v2 = vmul.f32 0.5, %v188_v59  ;;  %v178_v10 = vmul.f32 %v491_v58, %v177_v63  ;;  %353 = vmatmul.bf16.vlgmr.msra.gmra.mxu2 %v265_v5  ;;  %vm184_vm15 = vmor %vm182_vm14, %vm183_vm10 }
  0xb0   :  { %v169_v9 = vmul.f32 0.5, %v168_v62 }
  0xb1   :  { %v190_v11 = vsub.f32 1.5, %v189_v2  ;;  %v179_v13 = vmul.f32 0.5, %v178_v10  ;;  %v493_v14 = vpop.eup %492 }
  0xb2   :  { %v170_v12 = vsub.f32 1.5, %v169_v9  ;;  %v197_v18 = vmul.f32 %v493_v14, %v162_v51  ;;  %vm203_vm0 = vweird.f32 %v493_v14 }
  0xb3   :  { %v495_v15 = vpop.eup %494  ;;  %v180_v17 = vsub.f32 1.5, %v179_v13  ;;  %v191_v21 = vmul.f32 %v487_v24, %v190_v11  ;;  %vm204_vm3 = vmor %vm202_vm2, %vm203_vm0 }
  0xb4   :  { %v171_v19 = vmul.f32 %v489_v50, %v170_v12  ;;  %v227_v26 = vmul.f32 %v495_v15, %v165_v56  ;;  %v198_v25 = vmul.f32 %v493_v14, %v197_v18  ;;  %vm233_vm1 = vweird.f32 %v495_v15 }
  0xb5   :  { %v181_v30 = vmul.f32 %v491_v58, %v180_v17  ;;  %v195_v35 = vsel %vm765_vm13, %v487_v24, %v191_v21  ;;  %vm234_vm5 = vmor %vm232_vm4, %vm233_vm1 }
  0xb6   :  { %v175_v29 = vsel %vm174_vm12, %v489_v50, %v171_v19  ;;  %v228_v32 = vmul.f32 %v495_v15, %v227_v26  ;;  %v199_v34 = vmul.f32 0.5, %v198_v25  ;;  %v238_v42 = vmul.f32 %v195_v35, %v154_v36 }
  0xb7   :  { %v236_v52 = vmul.f32 %v175_v29, %v152_v22  ;;  %v185_v23 = vsel %vm184_vm15, %v491_v58, %v181_v30 }
  0xb8   :  { %v229_v28 = vmul.f32 0.5, %v228_v32  ;;  %v237_v33 = vmul.f32 %v185_v23, %v153_v31  ;;  %v200_v40 = vsub.f32 1.5, %v199_v34  ;;  %v248_v38 = vmul.f32 %v741_v37, %v238_v42 }
  0xb9   :  { %v246_v39 = vmul.f32 %v741_v37, %v236_v52 }
  0xba   :  { %v230_v41 = vsub.f32 1.5, %v229_v28  ;;  %v247_v57 = vmul.f32 %v741_v37, %v237_v33  ;;  %v201_v44 = vmul.f32 %v493_v14, %v200_v40  ;;  %v258_v56 = vadd.f32 %v753_v48, %v248_v38 }
  0xbb   :  { %v256_v54 = vadd.f32 %v753_v48, %v246_v39 }
  0xbc   :  { %v257_v45 = vadd.f32 %v753_v48, %v247_v57  ;;  %v231_v46 = vmul.f32 %v495_v15, %v230_v41  ;;  %v205_v24 = vsel %vm204_vm3, %v493_v14, %v201_v44 }
  0xbd   :  { %v239_v50 = vmul.f32 %v205_v24, %v155_v43 }
  0xbe   :  { %v263_v49 = vpack.c.bf16 %v257_v45, %v256_v54  ;;  %v235_v53 = vsel %vm234_vm5, %v495_v15, %v231_v46 }
  0xbf   :  { %v242_v16 = vmul.f32 %v235_v53, %v158_v47  ;;  %v249_v51 = vmul.f32 %v741_v37, %v239_v50 }
  0xc0   :  { %343 = vmatmul.bf16.vlgmr.msra.gmra.mxu0 %v263_v49 }
  0xc1   :  { %v252_v55 = vmul.f32 %v741_v37, %v242_v16  ;;  %v259_v58 = vadd.f32 %v753_v48, %v249_v51 }
  0xc3   :  { %v262_v59 = vadd.f32 %v753_v48, %v252_v55  ;;  %v264_v20 = vpack.c.bf16 %v259_v58, %v258_v56 }
  0xc5   :  { %v266_v60 = vpack.c.bf16 %v262_v59, %v262_v59  ;;  %348 = vmatmul.bf16.vlgmr.msra.gmra.mxu1 %v264_v20 }
  0xc7   :  { %358 = vmatmul.bf16.vlgmr.msra.gmra.mxu3 %v266_v60 }
 0x132   :  { %v354_v62 = vpop.f32.mrf.mxu2 }
 0x133   :  { %v355_v63 = vadd.f32 %v479_v61, %v354_v62 }
 0x135   :  { %v367_v2 = vmax.f32 %v355_v63, 0.0 }
 0x137   :  { %v374_v5 = vadd.f32 %v367_v2, %v649_v0 }
 0x139   :  { %381 = vst [vmem:[#allocation8 + $0x20] sm:$0xff] %v374_v5 }
 0x13a   :  { %v356_v37 = vpop.f32.mrf.mxu2 }
 0x13b   :  { %v357_v9 = vadd.f32 %v479_v61, %v356_v37 }
 0x13d   :  { %v344_v10 = vpop.f32.mrf.mxu0  ;;  %v368_v11 = vmax.f32 %v357_v9, 0.0 }
 0x13e   :  { %v345_v12 = vadd.f32 %v479_v61, %v344_v10 }
 0x13f   :  { %v375_v48 = vadd.f32 %v368_v11, %v657_v3 }
 0x140   :  { %v363_v13 = vmax.f32 %v345_v12, 0.0 }
 0x141   :  { %382 = vst [vmem:[#allocation8 + $0x28] sm:$0xff] %v375_v48 }
 0x142   :  { %v370_v14 = vadd.f32 %v363_v13, %v651_v1  ;;  %v349_v15 = vpop.f32.mrf.mxu1 }
 0x143   :  { %v350_v17 = vadd.f32 %v479_v61, %v349_v15 }
 0x144   :  { %377 = vst [vmem:[#allocation8] sm:$0xff] %v370_v14 }
 0x145   :  { %v346_v18 = vpop.f32.mrf.mxu0  ;;  %v365_v19 = vmax.f32 %v350_v17, 0.0 }
 0x146   :  { %v347_v21 = vadd.f32 %v479_v61, %v346_v18 }
 0x147   :  { %v372_v0 = vadd.f32 %v365_v19, %v665_v6 }
 0x148   :  { %v364_v22 = vmax.f32 %v347_v21, 0.0 }
 0x149   :  { %379 = vst [vmem:[#allocation8 + $0x10] sm:$0xff] %v372_v0 }
 0x14a   :  { %v371_v26 = vadd.f32 %v364_v22, %v659_v4  ;;  %v359_v27 = vpop.f32.mrf.mxu3  ;;  %v351_v25 = vpop.f32.mrf.mxu1 }
 0x14b   :  { %v360_v29 = vadd.f32 %v479_v61, %v359_v27  ;;  %v352_v3 = vadd.f32 %v479_v61, %v351_v25 }
 0x14c   :  { %378 = vst [vmem:[#allocation8 + $0x8] sm:$0xff] %v371_v26 }
 0x14d   :  { %v369_v30 = vmax.f32 %v360_v29, 0.0  ;;  %v366_v1 = vmax.f32 %v352_v3, 0.0 }
 0x14f   :  { %v376_v31 = vadd.f32 %v369_v30, %v667_v7  ;;  %v373_v6 = vadd.f32 %v366_v1, %v669_v8 }
 0x151   :  { %383 = vst [vmem:[#allocation8 + $0x30] sm:$0xff] %v376_v31 }
 0x152   :  { %380 = vst [vmem:[#allocation8 + $0x18] sm:$0xff] %v373_v6  ;;  %v361_v4 = vpop.f32.mrf.mxu3 }
 0x153   :  { %396 = dma.vmem_to_hbm [thread:$0]  %s389_s12, 896, %s391_s15, [#allocation4], %s600_s28, %s600_s28, %s601_s29  }
 0x154   :  { %596 = dma.done.wait [#allocation4], 896  }
 0x155   :  { %597 = vsyncadd [#allocation4], 4294966400 }
 0x156   :  { %401 = vsyncpa [#allocation3], 1 }
 0x157   :  { %402 = vsyncpa [#allocation6], 1 }
 0x158   :  { %403 = vsyncpa [#allocation4], 1 }

// kernel: tpu_custom_call.1
= control target key start
LH: loop header
LB: loop body
LE: loop exit
PB: predicated region body
PF: predicated region fallthrough
CT: control target
= control target key end

     0   :  { %10 = vsyncpa [#allocation3], 0  ;;  %s807_s0 = inlined_call_operand.hbm [shape: f32[56,128], index: 0, kind: input, shape index: {}]   ;;  %s808_s1 = inlined_call_operand.hbm [shape: f32[1,128], index: 1, kind: input, shape index: {}]   ;;  %s809_s2 = inlined_call_operand.vmem [shape: f32[1,128], index: 2, kind: input, shape index: {}]   ;;  %s810_s3 = inlined_call_operand.hbm [shape: bf16[128,128], index: 3, kind: input, shape index: {}]   ;;  %s811_s4 = inlined_call_operand.vmem [shape: f32[1,128], index: 4, kind: input, shape index: {}]   ;;  %s812_s5 = inlined_call_operand.hbm [shape: f32[56,128], index: 5, kind: output, shape index: {}]  }
   0x1   :  { %11 = vsyncpa [#allocation6], 0  ;;  %s31_s20 = sshll.u32 %s808_s1, 4  ;;  %s32_s20 = int_to_ptr.hbm [resolvable:$true] %s31_s20 }
   0x2   :  { %12 = vsyncpa [#allocation4], 0  ;;  %s598_s21 = smov [#allocation5]   ;;  %s17_s25 = sshll.u32 %s807_s0, 4  ;;  %s18_s25 = int_to_ptr.hbm [resolvable:$true] %s17_s25 }
   0x3   :  { %s33_s22 = sshll.u32 %s598_s21, 4  ;;  %s599_s26 = smov [#allocation2]   ;;  %s34_s22 = int_to_ptr.vmem [resolvable:$true] %s33_s22 }
   0x4   :  { %36 = dma.hbm_to_vmem [thread:$0]  %s32_s20, 16, %s34_s22, [#allocation6]  }
   0x5   :  { %s19_s27 = sshll.u32 %s599_s26, 4  ;;  %s600_s28 = smov 128   ;;  %s20_s27 = int_to_ptr.vmem [resolvable:$true] %s19_s27 }
   0x6   :  { %s601_s29 = smov 8   ;;  %s43_s6 = sshll.u32 %s810_s3, 4  ;;  %s44_s6 = int_to_ptr.hbm [resolvable:$true] %s43_s6 }
   0x7   :  { %25 = dma.hbm_to_vmem [thread:$0]  %s18_s25, 896, %s20_s27, [#allocation3], %s600_s28, %s600_s28, %s601_s29  }
   0x8   :  { %s602_s7 = smov [#allocation7]   ;;  %s603_s0 = smov 64  }
   0x9   :  { %s45_s8 = sshll.u32 %s602_s7, 4  ;;  %s604_s9 = smov 4   ;;  %s46_s8 = int_to_ptr.vmem [resolvable:$true] %s45_s8 }
   0xa   :  { %51 = dma.hbm_to_vmem [thread:$0]  %s44_s6, 1024, %s46_s8, [#allocation6], %s603_s0, %s603_s0, %s604_s9  }
   0xb   :  { %592 = dma.done.wait [#allocation3], 896  }
   0xc   :  { %593 = vsyncadd [#allocation3], 4294966400 }
   0xd   :  { %594 = dma.done.wait [#allocation6], 1040  }
   0xe   :  { %595 = vsyncadd [#allocation6], 4294966256  ;;  %v649_v0 = vld [vmem:[#allocation2 + $0x20] sm:$0xff]  ;;  %v657_v3 = vld [vmem:[#allocation2 + $0x28] sm:$0xff]  ;;  %v605_v14 = vmov 128.0   ;;  %s390_s15 = sshll.u32 %s812_s5, 4  ;;  %s391_s15 = int_to_ptr.hbm [resolvable:$true] %s390_s15 }
   0xf   :  { %v651_v1 = vld [vmem:[#allocation2] sm:$0xff]  ;;  %83 = vadd.xlane.f32.xlu0 %v649_v0  ;;  %v107_v2 = vmul.f32 %v649_v0, %v649_v0  ;;  %v659_v4 = vld [vmem:[#allocation2 + $0x8] sm:$0xff]  ;;  %v108_v5 = vmul.f32 %v657_v3, %v657_v3  ;;  %v665_v6 = vld [vmem:[#allocation2 + $0x10] sm:$0xff]  ;;  %480 = vrcp.f32 %v605_v14 }
  0x10   :  { %75 = vadd.xlane.f32.xlu2 %v651_v1  ;;  %v667_v7 = vld [vmem:[#allocation2 + $0x30] sm:$0xff]  ;;  %v669_v8 = vld [vmem:[#allocation2 + $0x18] sm:$0xff]  ;;  %v105_v9 = vmul.f32 %v665_v6, %v665_v6  ;;  %v103_v10 = vmul.f32 %v651_v1, %v651_v1  ;;  %v104_v11 = vmul.f32 %v659_v4, %v659_v4  ;;  %v441_v21 = vld [vmem:[#allocation7 + $0x28] sm:$0xff] }
  0x11   :  { %118 = vadd.xlane.f32.xlu1 %v107_v2  ;;  %v106_v12 = vmul.f32 %v669_v8, %v669_v8  ;;  %v109_v13 = vmul.f32 %v667_v7, %v667_v7  ;;  %v443_v16 = vld [vmem:[#allocation7 + $0x38] sm:$0xff]  ;;  %v442_v18 = vld [vmem:[#allocation7 + $0x30] sm:$0xff]  ;;  %v440_v23 = vld [vmem:[#allocation7 + $0x20] sm:$0xff] }
  0x12   :  { %445 = vmatpush.bf16.msra.mxu2 %v443_v16  ;;  %335 = vmatpush.bf16.msra.mxu0 %v443_v16  ;;  %v439_v25 = vld [vmem:[#allocation7 + $0x18] sm:$0xff]  ;;  %v438_v30 = vld [vmem:[#allocation7 + $0x10] sm:$0xff]  ;;  %v437_v34 = vld [vmem:[#allocation7 + $0x8] sm:$0xff] }
  0x13   :  { %444 = vmatpush.bf16.msra.mxu1 %v443_v16  ;;  %446 = vmatpush.bf16.msra.mxu3 %v443_v16  ;;  %v436_v41 = vld [vmem:[#allocation7] sm:$0xff] }
  0x15   :  { %v481_v15 = vpop.eup %480 }
  0x16   :  { %v90_v17 = vmul.f32 128.0, %v481_v15  ;;  %448 = vmatpush.bf16.msra.mxu2 %v442_v18  ;;  %336 = vmatpush.bf16.msra.mxu0 %v442_v18  ;;  %vm94_vm0 = vweird.f32 %v481_v15 }
  0x17   :  { %85 = vadd.xlane.f32.xlu0 %v657_v3  ;;  %447 = vmatpush.bf16.msra.mxu1 %v442_v18 }
  0x18   :  { %77 = vadd.xlane.f32.xlu2 %v659_v4  ;;  %v91_v19 = vsub.f32 1.0, %v90_v17  ;;  %449 = vmatpush.bf16.msra.mxu3 %v442_v18 }
  0x19   :  { %120 = vadd.xlane.f32.xlu1 %v108_v5 }
  0x1a   :  { %v92_v20 = vmul.f32 %v481_v15, %v91_v19  ;;  %451 = vmatpush.bf16.msra.mxu2 %v441_v21  ;;  %337 = vmatpush.bf16.msra.mxu0 %v441_v21 }
  0x1b   :  { %450 = vmatpush.bf16.msra.mxu1 %v441_v21 }
  0x1c   :  { %452 = vmatpush.bf16.msra.mxu3 %v441_v21  ;;  %v93_v22 = vadd.f32 %v481_v15, %v92_v20 }
  0x1e   :  { %454 = vmatpush.bf16.msra.mxu2 %v440_v23  ;;  %338 = vmatpush.bf16.msra.mxu0 %v440_v23  ;;  %v684_v24 = vsel %vm94_vm0, %v481_v15, %v93_v22 }
  0x1f   :  { %79 = vadd.xlane.f32.xlu0 %v665_v6  ;;  %453 = vmatpush.bf16.msra.mxu1 %v440_v23 }
  0x20   :  { %87 = vadd.xlane.f32.xlu2 %v667_v7  ;;  %455 = vmatpush.bf16.msra.mxu3 %v440_v23 }
  0x21   :  { %81 = vadd.xlane.f32.xlu1 %v669_v8 }
  0x22   :  { %457 = vmatpush.bf16.msra.mxu2 %v439_v25  ;;  %339 = vmatpush.bf16.msra.mxu0 %v439_v25 }
  0x23   :  { %456 = vmatpush.bf16.msra.mxu1 %v439_v25 }
  0x24   :  { %458 = vmatpush.bf16.msra.mxu3 %v439_v25 }
  0x26   :  { %460 = vmatpush.bf16.msra.mxu2 %v438_v30  ;;  %340 = vmatpush.bf16.msra.mxu0 %v438_v30 }
  0x27   :  { %110 = vadd.xlane.f32.xlu0 %v103_v10  ;;  %459 = vmatpush.bf16.msra.mxu1 %v438_v30 }
  0x28   :  { %114 = vadd.xlane.f32.xlu2 %v105_v9  ;;  %461 = vmatpush.bf16.msra.mxu3 %v438_v30 }
  0x29   :  { %112 = vadd.xlane.f32.xlu1 %v104_v11 }
  0x2a   :  { %463 = vmatpush.bf16.msra.mxu2 %v437_v34  ;;  %341 = vmatpush.bf16.msra.mxu0 %v437_v34 }
  0x2b   :  { %462 = vmatpush.bf16.msra.mxu1 %v437_v34 }
  0x2c   :  { %464 = vmatpush.bf16.msra.mxu3 %v437_v34 }
  0x2e   :  { %466 = vmatpush.bf16.msra.mxu2 %v436_v41  ;;  %342 = vmatpush.bf16.msra.mxu0 %v436_v41 }
  0x2f   :  { %116 = vadd.xlane.f32.xlu0 %v106_v12  ;;  %465 = vmatpush.bf16.msra.mxu1 %v436_v41 }
  0x30   :  { %467 = vmatpush.bf16.msra.mxu3 %v436_v41 }
  0x31   :  { %122 = vadd.xlane.f32.xlu1 %v109_v13 }
  0x82   :  { %v84_v26 = vpop.xlane.xlu0 %83 }
  0x83   :  { %v76_v27 = vpop.xlane.xlu2 %75  ;;  %v687_v28 = vmul.f32 %v684_v24, %v84_v26 }
  0x84   :  { %v119_v29 = vpop.xlane.xlu1 %118  ;;  %v699_v52 = vmul.f32 %v684_v24, %v76_v27 }
  0x85   :  { %v135_v31 = vmul.f32 %v687_v28, %v687_v28  ;;  %v128_v32 = vmul.f32 %v119_v29, %v684_v24  ;;  %v156_v27 = vsub.f32 %v649_v0, %v687_v28 }
  0x86   :  { %v131_v56 = vmul.f32 %v699_v52, %v699_v52 }
  0x87   :  { %v142_v33 = vsub.f32 %v128_v32, %v135_v31 }
  0x89   :  { %v149_v35 = vmax.f32 %v142_v33, 0.0 }
  0x8a   :  { %v86_v36 = vpop.xlane.xlu0 %85 }
  0x8b   :  { %v78_v37 = vpop.xlane.xlu2 %77  ;;  %v693_v38 = vmul.f32 %v684_v24, %v86_v36  ;;  %v163_v39 = vadd.f32 1e-05, %v149_v35 }
  0x8c   :  { %v121_v40 = vpop.xlane.xlu1 %120  ;;  %v707_v57 = vmul.f32 %v684_v24, %v78_v37  ;;  %v741_v37 = vld [vmem:[#allocation5] ss:$0 sm:$0xff] }
  0x8d   :  { %v136_v42 = vmul.f32 %v693_v38, %v693_v38  ;;  %482 = vrsqrt.f32 %v163_v39  ;;  %v129_v43 = vmul.f32 %v121_v40, %v684_v24  ;;  %vm212_vm2 = vweird.f32 %v163_v39 }
  0x8e   :  { %v132_v12 = vmul.f32 %v707_v57, %v707_v57  ;;  %v157_v41 = vsub.f32 %v657_v3, %v693_v38 }
  0x8f   :  { %v143_v44 = vsub.f32 %v129_v43, %v136_v42 }
  0x91   :  { %v150_v45 = vmax.f32 %v143_v44, 0.0 }
  0x92   :  { %v80_v46 = vpop.xlane.xlu0 %79 }
  0x93   :  { %v88_v47 = vpop.xlane.xlu2 %87  ;;  %v483_v48 = vpop.eup %482  ;;  %v164_v49 = vadd.f32 1e-05, %v150_v45  ;;  %v702_v54 = vmul.f32 %v684_v24, %v80_v46 }
  0x94   :  { %v82_v50 = vpop.xlane.xlu1 %81  ;;  %v207_v51 = vmul.f32 %v483_v48, %v163_v39  ;;  %vm213_vm1 = vweird.f32 %v483_v48  ;;  %v724_v20 = vmul.f32 %v684_v24, %v88_v47 }
  0x95   :  { %484 = vrsqrt.f32 %v164_v49  ;;  %v133_v61 = vmul.f32 %v702_v54, %v702_v54  ;;  %v717_v16 = vmul.f32 %v684_v24, %v82_v50  ;;  %vm719_vm3 = vmor %vm212_vm2, %vm213_vm1  ;;  %vm222_vm5 = vweird.f32 %v164_v49 }
  0x96   :  { %v208_v53 = vmul.f32 %v483_v48, %v207_v51  ;;  %v137_v28 = vmul.f32 %v724_v20, %v724_v20 }
  0x97   :  { %v134_v32 = vmul.f32 %v717_v16, %v717_v16 }
  0x98   :  { %v209_v55 = vmul.f32 0.5, %v208_v53 }
  0x9a   :  { %v111_v59 = vpop.xlane.xlu0 %110  ;;  %v210_v60 = vsub.f32 1.5, %v209_v55 }
  0x9b   :  { %v115_v58 = vpop.xlane.xlu2 %114  ;;  %v124_v63 = vmul.f32 %v111_v59, %v684_v24  ;;  %v485_v2 = vpop.eup %484 }
  0x9c   :  { %v126_v62 = vmul.f32 %v115_v58, %v684_v24  ;;  %v113_v5 = vpop.xlane.xlu1 %112  ;;  %v217_v9 = vmul.f32 %v485_v2, %v164_v49  ;;  %v211_v14 = vmul.f32 %v483_v48, %v210_v60  ;;  %vm223_vm4 = vweird.f32 %v485_v2 }
  0x9d   :  { %v138_v11 = vsub.f32 %v124_v63, %v131_v56  ;;  %v125_v13 = vmul.f32 %v113_v5, %v684_v24  ;;  %vm224_vm6 = vmor %vm222_vm5, %vm223_vm4 }
  0x9e   :  { %v140_v10 = vsub.f32 %v126_v62, %v133_v61  ;;  %v218_v15 = vmul.f32 %v485_v2, %v217_v9  ;;  %v215_v26 = vsel %vm719_vm3, %v483_v48, %v211_v14  ;;  %v753_v48 = vld [vmem:[%s809_s2] ss:$0 sm:$0xff] }
  0x9f   :  { %v145_v18 = vmax.f32 %v138_v11, 0.0  ;;  %v139_v21 = vsub.f32 %v125_v13, %v132_v12  ;;  %v240_v36 = vmul.f32 %v215_v26, %v156_v27 }
  0xa0   :  { %v147_v17 = vmax.f32 %v140_v10, 0.0  ;;  %v219_v22 = vmul.f32 0.5, %v218_v15 }
  0xa1   :  { %v728_v25 = vadd.f32 1e-05, %v145_v18  ;;  %v146_v29 = vmax.f32 %v139_v21, 0.0  ;;  %v250_v47 = vmul.f32 %v741_v37, %v240_v36  ;;  %v154_v36 = vsub.f32 %v665_v6, %v702_v54 }
  0xa2   :  { %v726_v23 = vadd.f32 1e-05, %v147_v17  ;;  %v117_v30 = vpop.xlane.xlu0 %116  ;;  %v220_v31 = vsub.f32 1.5, %v219_v22  ;;  %v152_v22 = vsub.f32 %v651_v1, %v699_v52 }
  0xa3   :  { %v738_v33 = vadd.f32 1e-05, %v146_v29  ;;  %v127_v34 = vmul.f32 %v117_v30, %v684_v24  ;;  %v260_v60 = vadd.f32 %v753_v48, %v250_v47  ;;  %vm172_vm9 = vweird.f32 %v728_v25 }
  0xa4   :  { %486 = vrsqrt.f32 %v726_v23  ;;  %v123_v35 = vpop.xlane.xlu1 %122  ;;  %v221_v40 = vmul.f32 %v485_v2, %v220_v31  ;;  %vm192_vm11 = vweird.f32 %v726_v23  ;;  %v153_v31 = vsub.f32 %v659_v4, %v707_v57 }
  0xa5   :  { %488 = vrsqrt.f32 %v728_v25  ;;  %v130_v39 = vmul.f32 %v123_v35, %v684_v24  ;;  %v141_v42 = vsub.f32 %v127_v34, %v134_v32  ;;  %vm182_vm14 = vweird.f32 %v738_v33 }
  0xa6   :  { %490 = vrsqrt.f32 %v738_v33  ;;  %v225_v44 = vsel %vm224_vm6, %v485_v2, %v221_v40  ;;  %v158_v47 = vsub.f32 %v667_v7, %v724_v20 }
  0xa7   :  { %v144_v43 = vsub.f32 %v130_v39, %v137_v28  ;;  %v148_v45 = vmax.f32 %v141_v42, 0.0  ;;  %v241_v46 = vmul.f32 %v225_v44, %v157_v41 }
  0xa9   :  { %v151_v49 = vmax.f32 %v144_v43, 0.0  ;;  %v162_v51 = vadd.f32 1e-05, %v148_v45  ;;  %v251_v53 = vmul.f32 %v741_v37, %v241_v46  ;;  %v155_v43 = vsub.f32 %v669_v8, %v717_v16 }
  0xaa   :  { %v487_v24 = vpop.eup %486 }
  0xab   :  { %v489_v50 = vpop.eup %488  ;;  %v187_v38 = vmul.f32 %v487_v24, %v726_v23  ;;  %v165_v56 = vadd.f32 1e-05, %v151_v49  ;;  %492 = vrsqrt.f32 %v162_v51  ;;  %v261_v61 = vadd.f32 %v753_v48, %v251_v53 }
  0xac   :  { %v167_v55 = vmul.f32 %v489_v50, %v728_v25  ;;  %v491_v58 = vpop.eup %490  ;;  %vm173_vm7 = vweird.f32 %v489_v50  ;;  %vm193_vm8 = vweird.f32 %v487_v24  ;;  %vm202_vm2 = vweird.f32 %v162_v51 }
  0xad   :  { %v188_v59 = vmul.f32 %v487_v24, %v187_v38  ;;  %v177_v63 = vmul.f32 %v491_v58, %v738_v33  ;;  %494 = vrsqrt.f32 %v165_v56  ;;  %v265_v5 = vpack.c.bf16 %v261_v61, %v260_v60  ;;  %vm174_vm12 = vmor %vm172_vm9, %vm173_vm7  ;;  %v479_v61 = vld [vmem:[%s811_s4] ss:$0 sm:$0xff]  ;;  %s606_s4 = smov [#allocation8]  }
  0xae   :  { %v168_v62 = vmul.f32 %v489_v50, %v167_v55  ;;  %vm183_vm10 = vweird.f32 %v491_v58  ;;  %vm765_vm13 = vmor %vm192_vm11, %vm193_vm8  ;;  %vm232_vm4 = vweird.f32 %v165_v56  ;;  %s388_s12 = sshll.u32 %s606_s4, 4  ;;  %s389_s12 = int_to_ptr.vmem [resolvable:$true] %s388_s12 }
  0xaf   :  { %v189_v2 = vmul.f32 0.5, %v188_v59  ;;  %v178_v10 = vmul.f32 %v491_v58, %v177_v63  ;;  %353 = vmatmul.bf16.vlgmr.msra.gmra.mxu2 %v265_v5  ;;  %vm184_vm15 = vmor %vm182_vm14, %vm183_vm10 }
  0xb0   :  { %v169_v9 = vmul.f32 0.5, %v168_v62 }
  0xb1   :  { %v190_v11 = vsub.f32 1.5, %v189_v2  ;;  %v179_v13 = vmul.f32 0.5, %v178_v10  ;;  %v493_v14 = vpop.eup %492 }
  0xb2   :  { %v170_v12 = vsub.f32 1.5, %v169_v9  ;;  %v197_v18 = vmul.f32 %v493_v14, %v162_v51  ;;  %vm203_vm0 = vweird.f32 %v493_v14 }
  0xb3   :  { %v495_v15 = vpop.eup %494  ;;  %v180_v17 = vsub.f32 1.5, %v179_v13  ;;  %v191_v21 = vmul.f32 %v487_v24, %v190_v11  ;;  %vm204_vm3 = vmor %vm202_vm2, %vm203_vm0 }
  0xb4   :  { %v171_v19 = vmul.f32 %v489_v50, %v170_v12  ;;  %v227_v26 = vmul.f32 %v495_v15, %v165_v56  ;;  %v198_v25 = vmul.f32 %v493_v14, %v197_v18  ;;  %vm233_vm1 = vweird.f32 %v495_v15 }
  0xb5   :  { %v181_v30 = vmul.f32 %v491_v58, %v180_v17  ;;  %v195_v35 = vsel %vm765_vm13, %v487_v24, %v191_v21  ;;  %vm234_vm5 = vmor %vm232_vm4, %vm233_vm1 }
  0xb6   :  { %v175_v29 = vsel %vm174_vm12, %v489_v50, %v171_v19  ;;  %v228_v32 = vmul.f32 %v495_v15, %v227_v26  ;;  %v199_v34 = vmul.f32 0.5, %v198_v25  ;;  %v238_v42 = vmul.f32 %v195_v35, %v154_v36 }
  0xb7   :  { %v236_v52 = vmul.f32 %v175_v29, %v152_v22  ;;  %v185_v23 = vsel %vm184_vm15, %v491_v58, %v181_v30 }
  0xb8   :  { %v229_v28 = vmul.f32 0.5, %v228_v32  ;;  %v237_v33 = vmul.f32 %v185_v23, %v153_v31  ;;  %v200_v40 = vsub.f32 1.5, %v199_v34  ;;  %v248_v38 = vmul.f32 %v741_v37, %v238_v42 }
  0xb9   :  { %v246_v39 = vmul.f32 %v741_v37, %v236_v52 }
  0xba   :  { %v230_v41 = vsub.f32 1.5, %v229_v28  ;;  %v247_v57 = vmul.f32 %v741_v37, %v237_v33  ;;  %v201_v44 = vmul.f32 %v493_v14, %v200_v40  ;;  %v258_v56 = vadd.f32 %v753_v48, %v248_v38 }
  0xbb   :  { %v256_v54 = vadd.f32 %v753_v48, %v246_v39 }
  0xbc   :  { %v257_v45 = vadd.f32 %v753_v48, %v247_v57  ;;  %v231_v46 = vmul.f32 %v495_v15, %v230_v41  ;;  %v205_v24 = vsel %vm204_vm3, %v493_v14, %v201_v44 }
  0xbd   :  { %v239_v50 = vmul.f32 %v205_v24, %v155_v43 }
  0xbe   :  { %v263_v49 = vpack.c.bf16 %v257_v45, %v256_v54  ;;  %v235_v53 = vsel %vm234_vm5, %v495_v15, %v231_v46 }
  0xbf   :  { %v242_v16 = vmul.f32 %v235_v53, %v158_v47  ;;  %v249_v51 = vmul.f32 %v741_v37, %v239_v50 }
  0xc0   :  { %343 = vmatmul.bf16.vlgmr.msra.gmra.mxu0 %v263_v49 }
  0xc1   :  { %v252_v55 = vmul.f32 %v741_v37, %v242_v16  ;;  %v259_v58 = vadd.f32 %v753_v48, %v249_v51 }
  0xc3   :  { %v262_v59 = vadd.f32 %v753_v48, %v252_v55  ;;  %v264_v20 = vpack.c.bf16 %v259_v58, %v258_v56 }
  0xc5   :  { %v266_v60 = vpack.c.bf16 %v262_v59, %v262_v59  ;;  %348 = vmatmul.bf16.vlgmr.msra.gmra.mxu1 %v264_v20 }
  0xc7   :  { %358 = vmatmul.bf16.vlgmr.msra.gmra.mxu3 %v266_v60 }
 0x132   :  { %v354_v62 = vpop.f32.mrf.mxu2 }
 0x133   :  { %v355_v63 = vadd.f32 %v479_v61, %v354_v62 }
 0x135   :  { %v367_v2 = vmax.f32 %v355_v63, 0.0 }
 0x137   :  { %v374_v5 = vadd.f32 %v367_v2, %v649_v0 }
 0x139   :  { %381 = vst [vmem:[#allocation8 + $0x20] sm:$0xff] %v374_v5 }
 0x13a   :  { %v356_v37 = vpop.f32.mrf.mxu2 }
 0x13b   :  { %v357_v9 = vadd.f32 %v479_v61, %v356_v37 }
 0x13d   :  { %v344_v10 = vpop.f32.mrf.mxu0  ;;  %v368_v11 = vmax.f32 %v357_v9, 0.0 }
 0x13e   :  { %v345_v12 = vadd.f32 %v479_v61, %v344_v10 }
 0x13f   :  { %v375_v48 = vadd.f32 %v368_v11, %v657_v3 }
 0x140   :  { %v363_v13 = vmax.f32 %v345_v12, 0.0 }
 0x141   :  { %382 = vst [vmem:[#allocation8 + $0x28] sm:$0xff] %v375_v48 }
 0x142   :  { %v370_v14 = vadd.f32 %v363_v13, %v651_v1  ;;  %v349_v15 = vpop.f32.mrf.mxu1 }
 0x143   :  { %v350_v17 = vadd.f32 %v479_v61, %v349_v15 }
 0x144   :  { %377 = vst [vmem:[#allocation8] sm:$0xff] %v370_v14 }
 0x145   :  { %v346_v18 = vpop.f32.mrf.mxu0  ;;  %v365_v19 = vmax.f32 %v350_v17, 0.0 }
 0x146   :  { %v347_v21 = vadd.f32 %v479_v61, %v346_v18 }
 0x147   :  { %v372_v0 = vadd.f32 %v365_v19, %v665_v6 }
 0x148   :  { %v364_v22 = vmax.f32 %v347_v21, 0.0 }
 0x149   :  { %379 = vst [vmem:[#allocation8 + $0x10] sm:$0xff] %v372_v0 }
 0x14a   :  { %v371_v26 = vadd.f32 %v364_v22, %v659_v4  ;;  %v359_v27 = vpop.f32.mrf.mxu3  ;;  %v351_v25 = vpop.f32.mrf.mxu1 }
 0x14b   :  { %v360_v29 = vadd.f32 %v479_v61, %v359_v27  ;;  %v352_v3 = vadd.f32 %v479_v61, %v351_v25 }
 0x14c   :  { %378 = vst [vmem:[#allocation8 + $0x8] sm:$0xff] %v371_v26 }
 0x14d   :  { %v369_v30 = vmax.f32 %v360_v29, 0.0  ;;  %v366_v1 = vmax.f32 %v352_v3, 0.0 }
 0x14f   :  { %v376_v31 = vadd.f32 %v369_v30, %v667_v7  ;;  %v373_v6 = vadd.f32 %v366_v1, %v669_v8 }
 0x151   :  { %383 = vst [vmem:[#allocation8 + $0x30] sm:$0xff] %v376_v31 }
 0x152   :  { %380 = vst [vmem:[#allocation8 + $0x18] sm:$0xff] %v373_v6  ;;  %v361_v4 = vpop.f32.mrf.mxu3 }
 0x153   :  { %396 = dma.vmem_to_hbm [thread:$0]  %s389_s12, 896, %s391_s15, [#allocation4], %s600_s28, %s600_s28, %s601_s29  }
 0x154   :  { %596 = dma.done.wait [#allocation4], 896  }
 0x155   :  { %597 = vsyncadd [#allocation4], 4294966400 }
 0x156   :  { %401 = vsyncpa [#allocation3], 1 }
 0x157   :  { %402 = vsyncpa [#allocation6], 1 }
 0x158   :  { %403 = vsyncpa [#allocation4], 1 }

</bundles_post_ra>
